<compile_context>
chip_gen: v7x
topology: tpu7x:2x2x1
jax: 0.10.0
libtpu: 0.0.40
codegen_flags: <defaults>
</compile_context>

<pallas_src>
import numpy as np

import jax
import jax.numpy as jnp
from jax import lax
from jax.experimental import pallas as pl
from jax.experimental.pallas import tpu as pltpu

# ----------------------------- problem sizes -----------------------------
B, C_IN, H, W = 2, 4, 16, 16          # input (NCHW)
C_OUT = 32                            # encoder feature width (z_pre dim)
N_CLASSES = 10                        # head output width
HW = H * W
ROWS = B * HW                         # 512 im2col rows (b, h, w)
K_TAPS = 9 * C_IN                     # 36 im2col columns
K_PAD = 40                            # 36 taps + 1 ones/bias column + pad
OUT_ROWS = 8                          # sublane-padded output rows
LANE_PAD = 128                        # lane-dense output / head width


# ----------------------------- Pallas kernel -----------------------------
def _encoder_head_kernel(patch_ref, cw_ref, pool_ref, hw_ref, hb_ref, out_ref):
    # patch: (512, 40) bf16   im2col patches; col 36 == 1.0 (bias column)
    # cw   : (40, 32)  bf16   conv weight; row 36 == conv bias
    # pool : (8, 512)  bf16   static block-diagonal 1/HW pooling matrix
    # hw   : (32, 128) bf16   head weight, lane-padded
    # hb   : (1, 128)  f32    head bias, lane-padded
    # out  : (8, 128)  f32    lane-dense padded output (wrapper slices (B, 10))

    # 3x3 conv + bias as ONE K=40 bf16 MXU dot with f32 accumulation.
    conv = jnp.dot(patch_ref[...], cw_ref[...],
                   preferred_element_type=jnp.float32)            # (512, 32) f32
    act = jnp.maximum(conv, 0.0).astype(jnp.bfloat16)             # ReLU + one cast

    # Global average pool: bf16 MXU dot against the static 1/HW matrix.
    z_pre = jnp.dot(pool_ref[...], act,
                    preferred_element_type=jnp.float32)           # (8, 32) f32

    # Linear head, lane-dense padded output (rows >= B / cols >= 10 are junk).
    yp = jnp.dot(z_pre.astype(jnp.bfloat16), hw_ref[...],
                 preferred_element_type=jnp.float32) + hb_ref[...]  # (8, 128) f32
    out_ref[...] = yp


# ----------------------------- one-time prepacking -----------------------------
def prepack_params(conv_w, conv_b, head_w, head_b):
    """Called once at init; outputs are reused by every forward call."""
    # conv_w: (Cout, Cin, 3, 3) OIHW -> (kh*3*Cin + kw*Cin + cin, Cout) = (36, 32),
    # then append the bias row (row 36) and zero-pad to (40, 32), bf16.
    w_mat = jnp.transpose(conv_w, (2, 3, 1, 0)).reshape(K_TAPS, C_OUT)
    w_mat = jnp.concatenate(
        [w_mat,
         conv_b.reshape(1, C_OUT),
         jnp.zeros((K_PAD - K_TAPS - 1, C_OUT), conv_w.dtype)],
        axis=0).astype(jnp.bfloat16)                               # (40, 32)

    # Static pooling matrix: row b averages rows [b*HW, (b+1)*HW).  1/256 is a
    # power of two, exact in bf16.
    pool_np = np.zeros((OUT_ROWS, ROWS), dtype=np.float32)
    for b in range(B):
        pool_np[b, b * HW:(b + 1) * HW] = 1.0 / HW
    pool = jnp.asarray(pool_np, dtype=jnp.bfloat16)                # (8, 512)

    # head_w: (n_cls, Cout) PyTorch layout -> (Cout, n_cls), lane-padded to 128.
    hwp = jnp.pad(head_w.T, ((0, 0), (0, LANE_PAD - N_CLASSES))).astype(jnp.bfloat16)
    hbp = jnp.pad(head_b.reshape(1, N_CLASSES),
                  ((0, 0), (0, LANE_PAD - N_CLASSES))).astype(jnp.float32)
    return w_mat, pool, hwp, hbp


# ----------------------------- per-call wrapper -----------------------------
@jax.jit
def encoder_with_head(x_nchw, cw_packed, pool, hw_packed, hb_packed):
    """Forward pass. x_nchw: (B, Cin, H, W) f32. Returns (B, N_CLASSES) f32."""
    b, c_in, h, w = x_nchw.shape
    assert (b, c_in, h, w) == (B, C_IN, H, W)

    # im2col done ONCE here (plain XLA glue, fused into a couple of kernels):
    # padded NHWC -> 9 shifted taps concatenated on the channel axis -> ones
    # column for the conv bias -> zero pad to K=40 -> single bf16 cast.
    xp = jnp.pad(jnp.transpose(x_nchw, (0, 2, 3, 1)),
                 ((0, 0), (1, 1), (1, 1), (0, 0)))                 # (B, H+2, W+2, Cin)
    taps = [xp[:, dh:dh + H, dw:dw + W, :]
            for dh in range(3) for dw in range(3)]
    patches = jnp.concatenate(taps, axis=-1).reshape(ROWS, K_TAPS)
    patches = jnp.concatenate(
        [patches,
         jnp.ones((ROWS, 1), patches.dtype),
         jnp.zeros((ROWS, K_PAD - K_TAPS - 1), patches.dtype)],
        axis=-1).astype(jnp.bfloat16)                              # (512, 40) bf16

    out_pad = pl.pallas_call(
        _encoder_head_kernel,
        out_shape=jax.ShapeDtypeStruct((OUT_ROWS, LANE_PAD), jnp.float32),
        grid=(1,),
        in_specs=[
            pl.BlockSpec((ROWS, K_PAD), lambda i: (0, 0)),
            pl.BlockSpec((K_PAD, C_OUT), lambda i: (0, 0)),
            pl.BlockSpec((OUT_ROWS, ROWS), lambda i: (0, 0)),
            pl.BlockSpec((C_OUT, LANE_PAD), lambda i: (0, 0)),
            pl.BlockSpec((1, LANE_PAD), lambda i: (0, 0)),
        ],
        out_specs=pl.BlockSpec((OUT_ROWS, LANE_PAD), lambda i: (0, 0)),
        compiler_params=pltpu.CompilerParams(
            dimension_semantics=("arbitrary",)),
    )(patches, cw_packed, pool, hw_packed, hb_packed)

    # Padded rows/cols contain head-bias garbage by construction; never reuse
    # out_pad beyond this slice.
    return out_pad[:B, :N_CLASSES]


# ----------------------------- reference (pure JAX, f32) -----------------------------
def _reference(x_nchw, conv_w, conv_b, head_w, head_b):
    y = lax.conv_general_dilated(
        x_nchw.astype(jnp.float32), conv_w.astype(jnp.float32),
        window_strides=(1, 1), padding=((1, 1), (1, 1)),
        dimension_numbers=("NCHW", "OIHW", "NCHW"))
    y = y + conv_b.reshape(1, C_OUT, 1, 1)
    y = jnp.maximum(y, 0.0)
    z_pre = jnp.mean(y, axis=(2, 3))                               # (B, Cout)
    return z_pre @ head_w.T + head_b


# ----------------------------- main -----------------------------
if __name__ == "__main__":
    key = jax.random.PRNGKey(0)
    kx, kcw, kcb, khw, khb = jax.random.split(key, 5)

    x = jax.random.normal(kx, (B, C_IN, H, W), dtype=jnp.float32)
    conv_w = jax.random.normal(kcw, (C_OUT, C_IN, 3, 3), dtype=jnp.float32) * 0.1
    conv_b = jax.random.normal(kcb, (C_OUT,), dtype=jnp.float32) * 0.1
    head_w = jax.random.normal(khw, (N_CLASSES, C_OUT), dtype=jnp.float32) * 0.1
    head_b = jax.random.normal(khb, (N_CLASSES,), dtype=jnp.float32) * 0.1

    # One-time weight prepacking (outside the per-call path).
    cw_packed, pool, hw_packed, hb_packed = prepack_params(
        conv_w, conv_b, head_w, head_b)

    yp = jax.block_until_ready(
        encoder_with_head(x, cw_packed, pool, hw_packed, hb_packed))

    ref = _reference(x, conv_w, conv_b, head_w, head_b)
    assert yp.shape == (B, N_CLASSES)
    # bf16 MXU operands (f32 accumulation inside each dot) -> compare against
    # the pure-f32 reference with a correspondingly loosened tolerance.
    assert jnp.allclose(yp, ref, atol=2e-2, rtol=2e-2), "mismatch vs reference"

    print("KERNEL_OK")
</pallas_src>

<mosaic_0001>
module attributes {stable_mosaic.version = 11 : i64} {
  func.func @_encoder_head_kernel(%arg0: i32, %arg1: memref<512x40xbf16, #tpu.memory_space<vmem>>, %arg2: memref<40x32xbf16, #tpu.memory_space<vmem>>, %arg3: memref<8x512xbf16, #tpu.memory_space<vmem>>, %arg4: memref<32x128xbf16, #tpu.memory_space<vmem>>, %arg5: memref<1x128xf32, #tpu.memory_space<vmem>>, %arg6: memref<8x128xf32, #tpu.memory_space<vmem>>) attributes {dimension_semantics = [#tpu.dimension_semantics<arbitrary>], iteration_bounds = array<i64: 1>, scalar_prefetch = 0 : i64, scratch_operands = 0 : i64, tpu.core_type = #tpu.core_type<tc>, window_params = [{pipeline_mode = #tpu.pipeline_mode<synchronous>, transform_indices = @transform_0, window_bounds = array<i64: 512, 40>}, {pipeline_mode = #tpu.pipeline_mode<synchronous>, transform_indices = @transform_1, window_bounds = array<i64: 40, 32>}, {pipeline_mode = #tpu.pipeline_mode<synchronous>, transform_indices = @transform_2, window_bounds = array<i64: 8, 512>}, {pipeline_mode = #tpu.pipeline_mode<synchronous>, transform_indices = @transform_3, window_bounds = array<i64: 32, 128>}, {pipeline_mode = #tpu.pipeline_mode<synchronous>, transform_indices = @transform_4, window_bounds = array<i64: 1, 128>}, {pipeline_mode = #tpu.pipeline_mode<synchronous>, transform_indices = @transform_5, window_bounds = array<i64: 8, 128>}]} {
    %c0 = arith.constant 0 : index
    %c0_0 = arith.constant 0 : index
    %0 = vector.load %arg1[%c0, %c0_0] : memref<512x40xbf16, #tpu.memory_space<vmem>>, vector<512x40xbf16>
    %c0_1 = arith.constant 0 : index
    %c0_2 = arith.constant 0 : index
    %1 = vector.load %arg2[%c0_1, %c0_2] : memref<40x32xbf16, #tpu.memory_space<vmem>>, vector<40x32xbf16>
    %cst = arith.constant dense<0.000000e+00> : vector<512x32xf32>
    %2 = tpu.matmul %0, %1, %cst {dimension_numbers = #tpu.dot_dimension_numbers<[1], [0], [0], [1], [0, 0, 1, 1], [], []>} : vector<512x40xbf16>, vector<40x32xbf16>, vector<512x32xf32> -> vector<512x32xf32>
    %cst_3 = arith.constant 0.000000e+00 : f32
    %3 = vector.broadcast %cst_3 : f32 to vector<512x32xf32>
    %4 = arith.maximumf %2, %3 : vector<512x32xf32>
    %5 = arith.truncf %4 : vector<512x32xf32> to vector<512x32xbf16>
    %c0_4 = arith.constant 0 : index
    %c0_5 = arith.constant 0 : index
    %6 = vector.load %arg3[%c0_4, %c0_5] : memref<8x512xbf16, #tpu.memory_space<vmem>>, vector<8x512xbf16>
    %cst_6 = arith.constant dense<0.000000e+00> : vector<8x32xf32>
    %7 = tpu.matmul %6, %5, %cst_6 {dimension_numbers = #tpu.dot_dimension_numbers<[1], [0], [0], [1], [0, 0, 1, 1], [], []>} : vector<8x512xbf16>, vector<512x32xbf16>, vector<8x32xf32> -> vector<8x32xf32>
    %8 = arith.truncf %7 : vector<8x32xf32> to vector<8x32xbf16>
    %c0_7 = arith.constant 0 : index
    %c0_8 = arith.constant 0 : index
    %9 = vector.load %arg4[%c0_7, %c0_8] : memref<32x128xbf16, #tpu.memory_space<vmem>>, vector<32x128xbf16>
    %cst_9 = arith.constant dense<0.000000e+00> : vector<8x128xf32>
    %10 = tpu.matmul %8, %9, %cst_9 {dimension_numbers = #tpu.dot_dimension_numbers<[1], [0], [0], [1], [0, 0, 1, 1], [], []>} : vector<8x32xbf16>, vector<32x128xbf16>, vector<8x128xf32> -> vector<8x128xf32>
    %c0_10 = arith.constant 0 : index
    %c0_11 = arith.constant 0 : index
    %11 = vector.load %arg5[%c0_10, %c0_11] : memref<1x128xf32, #tpu.memory_space<vmem>>, vector<1x128xf32>
    %12 = vector.broadcast %11 : vector<1x128xf32> to vector<8x128xf32>
    %13 = arith.addf %10, %12 : vector<8x128xf32>
    %c0_12 = arith.constant 0 : index
    %c0_13 = arith.constant 0 : index
    %14 = vector.load %arg6[%c0_12, %c0_13] : memref<8x128xf32, #tpu.memory_space<vmem>>, vector<8x128xf32>
    tpu.vector_store %arg6[%c0_12, %c0_13], %13 {strides = array<i32>} : memref<8x128xf32, #tpu.memory_space<vmem>>, vector<8x128xf32>,
    return
  }
  func.func @transform_0(%arg0: i32) -> (i32, i32) {
    %c0_i32 = arith.constant 0 : i32
    %c0_i32_0 = arith.constant 0 : i32
    %c0_i32_1 = arith.constant 0 : i32
    return %c0_i32, %c0_i32_0 : i32, i32
  }
  func.func @transform_1(%arg0: i32) -> (i32, i32) {
    %c0_i32 = arith.constant 0 : i32
    %c0_i32_0 = arith.constant 0 : i32
    %c0_i32_1 = arith.constant 0 : i32
    return %c0_i32, %c0_i32_0 : i32, i32
  }
  func.func @transform_2(%arg0: i32) -> (i32, i32) {
    %c0_i32 = arith.constant 0 : i32
    %c0_i32_0 = arith.constant 0 : i32
    %c0_i32_1 = arith.constant 0 : i32
    return %c0_i32, %c0_i32_0 : i32, i32
  }
  func.func @transform_3(%arg0: i32) -> (i32, i32) {
    %c0_i32 = arith.constant 0 : i32
    %c0_i32_0 = arith.constant 0 : i32
    %c0_i32_1 = arith.constant 0 : i32
    return %c0_i32, %c0_i32_0 : i32, i32
  }
  func.func @transform_4(%arg0: i32) -> (i32, i32) {
    %c0_i32 = arith.constant 0 : i32
    %c0_i32_0 = arith.constant 0 : i32
    %c0_i32_1 = arith.constant 0 : i32
    return %c0_i32, %c0_i32_0 : i32, i32
  }
  func.func @transform_5(%arg0: i32) -> (i32, i32) {
    %c0_i32 = arith.constant 0 : i32
    %c0_i32_0 = arith.constant 0 : i32
    %c0_i32_1 = arith.constant 0 : i32
    return %c0_i32, %c0_i32_0 : i32, i32
  }
}

</mosaic_0001>

<bundles_post_ra>
// kernel: encoder_with_head.1
= control target key start
LH: loop header
LB: loop body
LE: loop exit
PB: predicated region body
PF: predicated region fallthrough
CT: control target
= control target key end

     0   :  { %vm265_vm0 = vcmask 326656   ;;  %vm362_vm1 = vcmask 1043456   ;;  %vm1207_vm2 = vmmov 0   ;;  %vm871_vm3 = vcmask 261120   ;;  %s1453_s1 = inlined_call_operand.vmem [shape: bf16[40,32], index: 1, kind: input, shape index: {}]   ;;  %s1454_s0 = inlined_call_operand.vmem [shape: bf16[512,40], index: 0, kind: input, shape index: {}]   ;;  %s1455_s2 = inlined_call_operand.vmem [shape: bf16[8,512], index: 2, kind: input, shape index: {}]   ;;  %s1456_s3 = inlined_call_operand.vmem [shape: bf16[32,128], index: 3, kind: input, shape index: {}]   ;;  %s1457_s4 = inlined_call_operand.vmem [shape: f32[1,128], index: 4, kind: input, shape index: {}]   ;;  %s1458_s5 = inlined_call_operand.vmem [shape: f32[8,128], index: 5, kind: output, shape index: {}]  }
   0x1   :  { %v1165_v0 = vld [vmem:[%s1453_s1] sm:$0xff]   ;;  %v1166_v1 = vld [vmem:[%s1453_s1 + $0x8] sm:$0xff]   ;;  %v1167_v3 = vld [vmem:[%s1453_s1 + $0x10] ss:$0 sps:$4 sm:$0xff]  }
   0x2   :  { %1077 = vmatprep.subr.bf16.mxu0 %v1165_v0  ;;  %1155 = vmatprep.subr.bf16.mxu1 %v1165_v0  ;;  %v1168_v2 = vld [vmem:[%s1454_s0] sm:$0xff]   ;;  %v364_v4 = vsel %vm362_vm1, %v1167_v3, 0  ;;  %v1169_v5 = vld [vmem:[%s1454_s0 + $0x8] sm:$0xff]   ;;  %v1170_v6 = vld [vmem:[%s1454_s0 + $0x10] sm:$0xff]  }
   0x3   :  { %1078 = vmatpush3.bf16.msra.mxu0 %v1165_v0  ;;  %1158 = vmatpush3.bf16.msra.mxu1 %v1165_v0  ;;  %v1171_v7 = vld [vmem:[%s1454_s0 + $0x18] sm:$0xff]   ;;  %v1183_v8 = vld [vmem:[%s1454_s0 + $0xb0] sm:$0xff]   ;;  %v1172_v9 = vld [vmem:[%s1454_s0 + $0x20] sm:$0xff]  }
   0x4   :  { %1079 = vmatprep.subr.bf16.mxu0 %v1166_v1  ;;  %1156 = vmatprep.subr.bf16.mxu1 %v1166_v1  ;;  %v1185_v10 = vld [vmem:[%s1454_s0 + $0xb8] sm:$0xff]   ;;  %v1186_v11 = vld [vmem:[%s1454_s0 + $0xc0] sm:$0xff]   ;;  %v1173_v12 = vld [vmem:[%s1454_s0 + $0x28] sm:$0xff]  }
   0x5   :  { %1083 = vmatprep.mubr.msk.bf16.mxu0 %vm265_vm0, %v1168_v2  ;;  %1127 = vmatprep.mubr.msk.bf16.mxu1 %vm265_vm0, %v1183_v8  ;;  %v1174_v13 = vld [vmem:[%s1454_s0 + $0x30] sm:$0xff]   ;;  %v1188_v14 = vld [vmem:[%s1454_s0 + $0xc8] sm:$0xff]   ;;  %v1175_v16 = vld [vmem:[%s1454_s0 + $0x38] sm:$0xff]  }
   0x6   :  { %v1190_v15 = vld [vmem:[%s1454_s0 + $0xd0] sm:$0xff]   ;;  %v1192_v17 = vld [vmem:[%s1454_s0 + $0xd8] sm:$0xff]   ;;  %v1176_v18 = vld [vmem:[%s1454_s0 + $0x40] sm:$0xff]  }
   0x7   :  { %1080 = vmatpush3.bf16.msra.mxu0 %v1166_v1  ;;  %1159 = vmatpush3.bf16.msra.mxu1 %v1166_v1  ;;  %v1194_v19 = vld [vmem:[%s1454_s0 + $0xe0] sm:$0xff]   ;;  %v1177_v20 = vld [vmem:[%s1454_s0 + $0x48] sm:$0xff]   ;;  %v1178_v22 = vld [vmem:[%s1454_s0 + $0x50] sm:$0xff]  }
   0x8   :  { %1161 = vmatprep.subr.msk.bf16.mxu0 %vm362_vm1, %v1167_v3  ;;  %1162 = vmatprep.subr.msk.bf16.mxu1 %vm362_vm1, %v1167_v3  ;;  %v1196_v21 = vld [vmem:[%s1454_s0 + $0xe8] sm:$0xff]   ;;  %v1198_v23 = vld [vmem:[%s1454_s0 + $0xf0] sm:$0xff]   ;;  %v1179_v24 = vld [vmem:[%s1454_s0 + $0x58] sm:$0xff]  }
   0x9   :  { %v1199_v25 = vld [vmem:[%s1454_s0 + $0xf8] sm:$0xff]   ;;  %v1180_v26 = vld [vmem:[%s1454_s0 + $0x60] sm:$0xff]   ;;  %v1181_v27 = vld [vmem:[%s1454_s0 + $0x68] sm:$0xff]  }
   0xa   :  { %v1182_v28 = vld [vmem:[%s1454_s0 + $0x70] sm:$0xff]   ;;  %v1184_v29 = vld [vmem:[%s1454_s0 + $0x78] sm:$0xff]   ;;  %v1187_v30 = vld [vmem:[%s1454_s0 + $0x80] sm:$0xff]  }
   0xb   :  { %1082 = vmatpush3.bf16.msra.mxu0 %v364_v4  ;;  %1160 = vmatpush3.bf16.msra.mxu1 %v364_v4  ;;  %v1189_v31 = vld [vmem:[%s1454_s0 + $0x88] sm:$0xff]   ;;  %v1191_v32 = vld [vmem:[%s1454_s0 + $0x90] sm:$0xff]   ;;  %v1193_v33 = vld [vmem:[%s1454_s0 + $0x98] sm:$0xff]  }
   0xc   :  { %v1195_v34 = vld [vmem:[%s1454_s0 + $0xa0] sm:$0xff]   ;;  %v1197_v35 = vld [vmem:[%s1454_s0 + $0xa8] sm:$0xff]  }
   0xd   :  { %v1378_v36 = vld [vmem:[%s1455_s2] sm:$0xff] }
   0xe   :  { %1084 = vmatmul.mubr.msk.bf16.vlgmr.msra.gmra.mrb[0].mxu0 %vm265_vm0, %v1169_v5  ;;  %1128 = vmatmul.mubr.msk.bf16.vlgmr.msra.gmra.mrb[0].mxu1 %vm265_vm0, %v1185_v10  ;;  %v988_v37 = vcombine.high %v1378_v36, %v1378_v36 }
   0xf   :  { %1087 = vmatprep.mubr.msk.bf16.mxu0 %vm265_vm0, %v1170_v6  ;;  %1131 = vmatprep.mubr.msk.bf16.mxu1 %vm265_vm0, %v1186_v11 }
  0x16   :  { %1088 = vmatmul.mubr.msk.bf16.gmra.mrb[4].mxu0 %vm265_vm0, %v1171_v7  ;;  %1132 = vmatmul.mubr.msk.bf16.gmra.mrb[4].mxu1 %vm265_vm0, %v1188_v14 }
  0x17   :  { %1091 = vmatprep.mubr.msk.bf16.mxu0 %vm265_vm0, %v1172_v9  ;;  %1135 = vmatprep.mubr.msk.bf16.mxu1 %vm265_vm0, %v1190_v15 }
  0x1e   :  { %1092 = vmatmul.mubr.msk.bf16.gmra.mrb[8].mxu0 %vm265_vm0, %v1173_v12  ;;  %1136 = vmatmul.mubr.msk.bf16.gmra.mrb[8].mxu1 %vm265_vm0, %v1192_v17 }
  0x1f   :  { %1095 = vmatprep.mubr.msk.bf16.mxu0 %vm265_vm0, %v1174_v13  ;;  %1139 = vmatprep.mubr.msk.bf16.mxu1 %vm265_vm0, %v1194_v19 }
  0x26   :  { %1096 = vmatmul.mubr.msk.bf16.gmra.mrb[12].mxu0 %vm265_vm0, %v1175_v16  ;;  %1140 = vmatmul.mubr.msk.bf16.gmra.mrb[12].mxu1 %vm265_vm0, %v1196_v21 }
  0x27   :  { %1099 = vmatprep.mubr.msk.bf16.mxu0 %vm265_vm0, %v1176_v18  ;;  %1143 = vmatprep.mubr.msk.bf16.mxu1 %vm265_vm0, %v1198_v23 }
  0x2e   :  { %1100 = vmatmul.mubr.msk.bf16.gmra.mrb[16].mxu0 %vm265_vm0, %v1177_v20  ;;  %1144 = vmatmul.mubr.msk.bf16.gmra.mrb[16].mxu1 %vm265_vm0, %v1199_v25 }
  0x2f   :  { %1103 = vmatprep.mubr.msk.bf16.mxu0 %vm265_vm0, %v1178_v22  ;;  %799 = vmatprep.mubr.bf16.mxu1 %v988_v37 }
  0x36   :  { %1104 = vmatmul.mubr.msk.bf16.gmra.mrb[20].mxu0 %vm265_vm0, %v1179_v24 }
  0x37   :  { %1107 = vmatprep.mubr.msk.bf16.mxu0 %vm265_vm0, %v1180_v26 }
  0x3e   :  { %1108 = vmatmul.mubr.msk.bf16.gmra.mrb[24].mxu0 %vm265_vm0, %v1181_v27 }
  0x3f   :  { %1111 = vmatprep.mubr.msk.bf16.mxu0 %vm265_vm0, %v1182_v28 }
  0x46   :  { %1112 = vmatmul.mubr.msk.bf16.gmra.mrb[28].mxu0 %vm265_vm0, %v1184_v29 }
  0x47   :  { %1115 = vmatprep.mubr.msk.bf16.mxu0 %vm265_vm0, %v1187_v30 }
  0x4e   :  { %1116 = vmatmul.mubr.msk.bf16.gmra.mrb[32].mxu0 %vm265_vm0, %v1189_v31 }
  0x4f   :  { %1119 = vmatprep.mubr.msk.bf16.mxu0 %vm265_vm0, %v1191_v32 }
  0x56   :  { %1120 = vmatmul.mubr.msk.bf16.gmra.mrb[36].mxu0 %vm265_vm0, %v1193_v33 }
  0x57   :  { %1123 = vmatprep.mubr.msk.bf16.mxu0 %vm265_vm0, %v1195_v34 }
  0x5e   :  { %1124 = vmatmul.mubr.msk.bf16.gmra.mrb[40].mxu0 %vm265_vm0, %v1197_v35 }
  0xe1   :  { %v1085_v38 = vpop.f32.mrb[0].mxu0  ;;  %v1129_v49 = vpop.f32.mrb[0].mxu1 }
  0xe2   :  { %v400_v39 = vpop.f32.mrb[1].mxu0  ;;  %v657_v41 = vmax.f32 %v1085_v38, 0.0  ;;  %v701_v51 = vmax.f32 %v1129_v49, 0.0  ;;  %v576_v52 = vpop.f32.mrb[1].mxu1 }
  0xe3   :  { %v1086_v40 = vpop.f32.mrb[2].mxu0  ;;  %v655_v44 = vmax.f32 %v400_v39, 0.0  ;;  %v699_v54 = vmax.f32 %v576_v52, 0.0  ;;  %v1130_v55 = vpop.f32.mrb[2].mxu1 }
  0xe4   :  { %v658_v42 = vmax.f32 %v1086_v40, 0.0  ;;  %v403_v43 = vpop.f32.mrb[3].mxu0  ;;  %v702_v59 = vmax.f32 %v1130_v55, 0.0  ;;  %v579_v60 = vpop.f32.mrb[3].mxu1 }
  0xe5   :  { %v656_v45 = vmax.f32 %v403_v43, 0.0  ;;  %v700_v63 = vmax.f32 %v579_v60, 0.0 }
  0xe6   :  { %v1382_v46 = vpack.c.bf16 %v658_v42, %v657_v41  ;;  %v1388_v1 = vpack.c.bf16 %v702_v59, %v701_v51 }
  0xe7   :  { %v1384_v47 = vpack.c.bf16 %v656_v45, %v655_v44  ;;  %v1392_v3 = vpack.c.bf16 %v700_v63, %v699_v54 }
  0xe9   :  { %v1089_v48 = vpop.f32.mrb[4].mxu0  ;;  %v1133_v5 = vpop.f32.mrb[4].mxu1 }
  0xea   :  { %v416_v50 = vpop.f32.mrb[5].mxu0  ;;  %v661_v56 = vmax.f32 %v1089_v48, 0.0  ;;  %v705_v7 = vmax.f32 %v1133_v5, 0.0  ;;  %v592_v8 = vpop.f32.mrb[5].mxu1 }
  0xeb   :  { %v1090_v53 = vpop.f32.mrb[6].mxu0  ;;  %v659_v61 = vmax.f32 %v416_v50, 0.0  ;;  %v703_v10 = vmax.f32 %v592_v8, 0.0  ;;  %v1134_v11 = vpop.f32.mrb[6].mxu1 }
  0xec   :  { %v662_v57 = vmax.f32 %v1090_v53, 0.0  ;;  %v419_v58 = vpop.f32.mrb[7].mxu0  ;;  %v706_v15 = vmax.f32 %v1134_v11, 0.0  ;;  %v595_v16 = vpop.f32.mrb[7].mxu1 }
  0xed   :  { %v660_v62 = vmax.f32 %v419_v58, 0.0  ;;  %v704_v19 = vmax.f32 %v595_v16, 0.0 }
  0xee   :  { %v1386_v0 = vpack.c.bf16 %v662_v57, %v661_v56  ;;  %v1396_v21 = vpack.c.bf16 %v706_v15, %v705_v7 }
  0xef   :  { %v1390_v2 = vpack.c.bf16 %v660_v62, %v659_v61  ;;  %v1400_v23 = vpack.c.bf16 %v704_v19, %v703_v10 }
  0xf1   :  { %v1093_v4 = vpop.f32.mrb[8].mxu0  ;;  %v1137_v25 = vpop.f32.mrb[8].mxu1 }
  0xf2   :  { %v432_v6 = vpop.f32.mrb[9].mxu0  ;;  %v665_v12 = vmax.f32 %v1093_v4, 0.0  ;;  %v709_v27 = vmax.f32 %v1137_v25, 0.0  ;;  %v608_v28 = vpop.f32.mrb[9].mxu1 }
  0xf3   :  { %v1094_v9 = vpop.f32.mrb[10].mxu0  ;;  %v663_v17 = vmax.f32 %v432_v6, 0.0  ;;  %v707_v30 = vmax.f32 %v608_v28, 0.0  ;;  %v1138_v31 = vpop.f32.mrb[10].mxu1 }
  0xf4   :  { %v666_v13 = vmax.f32 %v1094_v9, 0.0  ;;  %v435_v14 = vpop.f32.mrb[11].mxu0  ;;  %v710_v35 = vmax.f32 %v1138_v31, 0.0  ;;  %v611_v37 = vpop.f32.mrb[11].mxu1 }
  0xf5   :  { %v664_v18 = vmax.f32 %v435_v14, 0.0  ;;  %v708_v40 = vmax.f32 %v611_v37, 0.0 }
  0xf6   :  { %v1394_v20 = vpack.c.bf16 %v666_v13, %v665_v12  ;;  %v1404_v42 = vpack.c.bf16 %v710_v35, %v709_v27 }
  0xf7   :  { %v1398_v22 = vpack.c.bf16 %v664_v18, %v663_v17  ;;  %v1408_v44 = vpack.c.bf16 %v708_v40, %v707_v30 }
  0xf9   :  { %v1097_v24 = vpop.f32.mrb[12].mxu0  ;;  %v1141_v48 = vpop.f32.mrb[12].mxu1 }
  0xfa   :  { %v448_v26 = vpop.f32.mrb[13].mxu0  ;;  %v669_v32 = vmax.f32 %v1097_v24, 0.0  ;;  %v713_v50 = vmax.f32 %v1141_v48, 0.0  ;;  %v624_v51 = vpop.f32.mrb[13].mxu1 }
  0xfb   :  { %v1098_v29 = vpop.f32.mrb[14].mxu0  ;;  %v667_v38 = vmax.f32 %v448_v26, 0.0  ;;  %v711_v53 = vmax.f32 %v624_v51, 0.0  ;;  %v1142_v54 = vpop.f32.mrb[14].mxu1 }
  0xfc   :  { %v670_v33 = vmax.f32 %v1098_v29, 0.0  ;;  %v451_v34 = vpop.f32.mrb[15].mxu0  ;;  %v714_v58 = vmax.f32 %v1142_v54, 0.0  ;;  %v627_v59 = vpop.f32.mrb[15].mxu1 }
  0xfd   :  { %v668_v39 = vmax.f32 %v451_v34, 0.0  ;;  %v712_v62 = vmax.f32 %v627_v59, 0.0 }
  0xfe   :  { %v1402_v41 = vpack.c.bf16 %v670_v33, %v669_v32  ;;  %v1410_v4 = vpack.c.bf16 %v714_v58, %v713_v50 }
  0xff   :  { %v1406_v43 = vpack.c.bf16 %v668_v39, %v667_v38  ;;  %v1412_v6 = vpack.c.bf16 %v712_v62, %v711_v53 }
 0x101   :  { %v1101_v45 = vpop.f32.mrb[16].mxu0  ;;  %v1145_v8 = vpop.f32.mrb[16].mxu1 }
 0x102   :  { %v464_v49 = vpop.f32.mrb[17].mxu0  ;;  %v673_v55 = vmax.f32 %v1101_v45, 0.0  ;;  %v717_v10 = vmax.f32 %v1145_v8, 0.0  ;;  %v640_v11 = vpop.f32.mrb[17].mxu1 }
 0x103   :  { %v1102_v52 = vpop.f32.mrb[18].mxu0  ;;  %v671_v60 = vmax.f32 %v464_v49, 0.0  ;;  %v715_v13 = vmax.f32 %v640_v11, 0.0  ;;  %v1146_v14 = vpop.f32.mrb[18].mxu1 }
 0x104   :  { %v674_v56 = vmax.f32 %v1102_v52, 0.0  ;;  %v467_v57 = vpop.f32.mrb[19].mxu0  ;;  %v718_v18 = vmax.f32 %v1146_v14, 0.0  ;;  %v643_v19 = vpop.f32.mrb[19].mxu1 }
 0x105   :  { %v672_v61 = vmax.f32 %v467_v57, 0.0  ;;  %v716_v26 = vmax.f32 %v643_v19, 0.0 }
 0x106   :  { %v728_v63 = vpack.c.bf16 %v674_v56, %v673_v55  ;;  %v1416_v28 = vpack.c.bf16 %v718_v18, %v717_v10 }
 0x107   :  { %v727_v5 = vpack.c.bf16 %v672_v61, %v671_v60  ;;  %v1418_v29 = vpack.c.bf16 %v716_v26, %v715_v13  ;;  %v1206_v26 = vmov 0.0  }
 0x109   :  { %v1105_v7 = vpop.f32.mrb[20].mxu0  ;;  %1030 = vmatprep.subr.bf16.mxu1 %v727_v5 }
 0x10a   :  { %v480_v9 = vpop.f32.mrb[21].mxu0  ;;  %1031 = vmatpush3.bf16.msra.mxu1 %v1384_v47  ;;  %v677_v15 = vmax.f32 %v1105_v7, 0.0 }
 0x10b   :  { %v1106_v12 = vpop.f32.mrb[22].mxu0  ;;  %1032 = vmatprep.subr.bf16.mxu1 %v728_v63  ;;  %v675_v24 = vmax.f32 %v480_v9, 0.0 }
 0x10c   :  { %v678_v16 = vmax.f32 %v1106_v12, 0.0  ;;  %v483_v17 = vpop.f32.mrb[23].mxu0 }
 0x10d   :  { %v676_v25 = vmax.f32 %v483_v17, 0.0 }
 0x10e   :  { %v730_v27 = vpack.c.bf16 %v678_v16, %v677_v15  ;;  %1033 = vmatpush3.bf16.msra.mxu1 %v1382_v46 }
 0x10f   :  { %v729_v47 = vpack.c.bf16 %v676_v25, %v675_v24 }
 0x111   :  { %v1109_v30 = vpop.f32.mrb[24].mxu0  ;;  %1034 = vmatprep.subr.bf16.mxu1 %v729_v47 }
 0x112   :  { %v496_v31 = vpop.f32.mrb[25].mxu0  ;;  %1035 = vmatpush3.bf16.msra.mxu1 %v1390_v2  ;;  %v681_v33 = vmax.f32 %v1109_v30, 0.0 }
 0x113   :  { %v1110_v32 = vpop.f32.mrb[26].mxu0  ;;  %1036 = vmatprep.subr.bf16.mxu1 %v730_v27  ;;  %v679_v37 = vmax.f32 %v496_v31, 0.0 }
 0x114   :  { %v682_v34 = vmax.f32 %v1110_v32, 0.0  ;;  %v499_v35 = vpop.f32.mrb[27].mxu0 }
 0x115   :  { %v680_v38 = vmax.f32 %v499_v35, 0.0  ;;  %v991_v35 = vld [vmem:[%s1457_s4] ss:$0 sm:$0xff] }
 0x116   :  { %v732_v39 = vpack.c.bf16 %v682_v34, %v681_v33  ;;  %1037 = vmatpush3.bf16.msra.mxu1 %v1386_v0 }
 0x117   :  { %v731_v46 = vpack.c.bf16 %v680_v38, %v679_v37 }
 0x119   :  { %v1113_v40 = vpop.f32.mrb[28].mxu0  ;;  %1038 = vmatprep.subr.bf16.mxu1 %v731_v46 }
 0x11a   :  { %v512_v45 = vpop.f32.mrb[29].mxu0  ;;  %1039 = vmatpush3.bf16.msra.mxu1 %v1398_v22  ;;  %v685_v49 = vmax.f32 %v1113_v40, 0.0  ;;  %v752_v22 = vld [vmem:[%s1455_s2 + $0x8] sm:$0xff] }
 0x11b   :  { %v1114_v48 = vpop.f32.mrb[30].mxu0  ;;  %1040 = vmatprep.subr.bf16.mxu1 %v732_v39  ;;  %v683_v51 = vmax.f32 %v512_v45, 0.0  ;;  %v990_v63 = vcombine.high %v752_v22, %v752_v22 }
 0x11c   :  { %v686_v2 = vmax.f32 %v1114_v48, 0.0  ;;  %v515_v50 = vpop.f32.mrb[31].mxu0 }
 0x11d   :  { %v684_v52 = vmax.f32 %v515_v50, 0.0 }
 0x11e   :  { %v734_v53 = vpack.c.bf16 %v686_v2, %v685_v49  ;;  %1041 = vmatpush3.bf16.msra.mxu1 %v1394_v20  ;;  %v987_v20 = vcombine.low %v1378_v36, %v1378_v36 }
 0x11f   :  { %v733_v54 = vpack.c.bf16 %v684_v52, %v683_v51 }
 0x121   :  { %1042 = vmatprep.subr.bf16.mxu1 %v733_v54  ;;  %v1117_v55 = vpop.f32.mrb[32].mxu0 }
 0x122   :  { %v689_v0 = vmax.f32 %v1117_v55, 0.0  ;;  %1043 = vmatpush3.bf16.msra.mxu1 %v1406_v43  ;;  %v528_v56 = vpop.f32.mrb[33].mxu0 }
 0x123   :  { %v1118_v57 = vpop.f32.mrb[34].mxu0  ;;  %1044 = vmatprep.subr.bf16.mxu1 %v734_v53  ;;  %v687_v60 = vmax.f32 %v528_v56, 0.0 }
 0x124   :  { %v690_v58 = vmax.f32 %v1118_v57, 0.0  ;;  %v531_v59 = vpop.f32.mrb[35].mxu0 }
 0x125   :  { %v688_v61 = vmax.f32 %v531_v59, 0.0 }
 0x126   :  { %v736_v62 = vpack.c.bf16 %v690_v58, %v689_v0  ;;  %1045 = vmatpush3.bf16.msra.mxu1 %v1402_v41 }
 0x127   :  { %v735_v5 = vpack.c.bf16 %v688_v61, %v687_v60  ;;  %1052 = vmatprep.subr.bf16.mxu1 %v1400_v23 }
 0x129   :  { %v1121_v43 = vpop.f32.mrb[36].mxu0  ;;  %800 = vmatmul.mubr.bf16.vlgmr.msra.gmra.mrb[20].mxu1 %v987_v20 }
 0x12a   :  { %v693_v7 = vmax.f32 %v1121_v43, 0.0  ;;  %1053 = vmatpush3.bf16.msra.mxu1 %v735_v5  ;;  %v544_v8 = vpop.f32.mrb[37].mxu0  ;;  %839 = vmatprep.mubr.bf16.mxu1 %v990_v63 }
 0x12b   :  { %v1122_v9 = vpop.f32.mrb[38].mxu0  ;;  %1054 = vmatprep.subr.bf16.mxu1 %v1396_v21  ;;  %v691_v12 = vmax.f32 %v544_v8, 0.0 }
 0x12c   :  { %v694_v10 = vmax.f32 %v1122_v9, 0.0  ;;  %v547_v11 = vpop.f32.mrb[39].mxu0 }
 0x12d   :  { %v692_v36 = vmax.f32 %v547_v11, 0.0 }
 0x12e   :  { %v738_v13 = vpack.c.bf16 %v694_v10, %v693_v7  ;;  %1055 = vmatpush3.bf16.msra.mxu1 %v736_v62 }
 0x12f   :  { %v737_v41 = vpack.c.bf16 %v692_v36, %v691_v12  ;;  %1056 = vmatprep.subr.bf16.mxu1 %v1408_v44  ;;  %v1204_v44 = vld [vmem:[%s1456_s3] sm:$0xff]  }
 0x131   :  { %v1125_v14 = vpop.f32.mrb[40].mxu0 }
 0x132   :  { %v697_v23 = vmax.f32 %v1125_v14, 0.0  ;;  %1057 = vmatpush3.bf16.msra.mxu1 %v737_v41  ;;  %v560_v15 = vpop.f32.mrb[41].mxu0 }
 0x133   :  { %v1126_v16 = vpop.f32.mrb[42].mxu0  ;;  %1058 = vmatprep.subr.bf16.mxu1 %v1404_v42  ;;  %v695_v19 = vmax.f32 %v560_v15, 0.0  ;;  %v989_v42 = vcombine.low %v752_v22, %v752_v22 }
 0x134   :  { %v698_v17 = vmax.f32 %v1126_v16, 0.0  ;;  %v563_v18 = vpop.f32.mrb[43].mxu0 }
 0x135   :  { %v696_v21 = vmax.f32 %v563_v18, 0.0 }
 0x136   :  { %v740_v24 = vpack.c.bf16 %v698_v17, %v697_v23  ;;  %1059 = vmatpush3.bf16.msra.mxu1 %v738_v13 }
 0x137   :  { %v739_v25 = vpack.c.bf16 %v696_v21, %v695_v19  ;;  %1060 = vmatprep.subr.bf16.mxu1 %v1412_v6 }
 0x13a   :  { %1061 = vmatpush3.bf16.msra.mxu1 %v739_v25 }
 0x13b   :  { %1062 = vmatprep.subr.bf16.mxu1 %v1410_v4  ;;  %v1205_v4 = vld [vmem:[%s1456_s3 + $0x8] sm:$0xff]  }
 0x13e   :  { %1063 = vmatpush3.bf16.msra.mxu1 %v740_v24 }
 0x13f   :  { %1064 = vmatprep.subr.bf16.mxu1 %v1418_v29 }
 0x142   :  { %1065 = vmatpush3.bf16.msra.mxu1 %v1392_v3 }
 0x143   :  { %1066 = vmatprep.subr.bf16.mxu1 %v1416_v28 }
 0x146   :  { %1067 = vmatpush3.bf16.msra.mxu1 %v1388_v1 }
 0x147   :  { %1147 = vmatprep.subr.bf16.mxu1 %v1206_v26 }
 0x149   :  { %840 = vmatmul.mubr.bf16.vlgmr.msra.gmra.mrb[24].mxu1 %v989_v42 }
 0x14a   :  { %1148 = vmatpush3.bf16.msra.mxu1 %v1204_v44  ;;  %1151 = vmatprep.mubr.msk.bf16.mxu1 %vm1207_vm2, %v1206_v26 }
 0x14b   :  { %1149 = vmatprep.subr.bf16.mxu1 %v1206_v26 }
 0x14e   :  { %1150 = vmatpush3.bf16.msra.mxu1 %v1205_v4 }
 0x1fc   :  { %v1046_v3 = vpop.f32.mrb[20].mxu1 }
 0x1fd   :  { %v1047_v6 = vpop.f32.mrb[21].mxu1 }
 0x1fe   :  { %v1048_v27 = vadd.f32 %v1047_v6, %v1046_v3  ;;  %v1049_v1 = vpop.f32.mrb[22].mxu1 }
 0x1ff   :  { %v1050_v28 = vpop.f32.mrb[23].mxu1 }
 0x21c   :  { %v1068_v47 = vpop.f32.mrb[24].mxu1 }
 0x21d   :  { %v1069_v29 = vpop.f32.mrb[25].mxu1 }
 0x21e   :  { %v1070_v30 = vadd.f32 %v1069_v29, %v1068_v47  ;;  %v1071_v31 = vpop.f32.mrb[26].mxu1 }
 0x21f   :  { %v1072_v32 = vpop.f32.mrb[27].mxu1 }
 0x220   :  { %v842_v33 = vadd.f32 %v1070_v30, %v1048_v27 }
 0x222   :  { %v847_v34 = vpack.c.bf16 %v842_v33, %v842_v33 }
 0x224   :  { %1152 = vmatmul.mubr.msk.bf16.vlgmr.msra.gmra.mrb[28].mxu1 %vm871_vm3, %v847_v34 }
 0x2f7   :  { %v909_v37 = vpop.f32.mrb[28].mxu1 }
 0x2f8   :  { %v910_v38 = vadd.f32 %v991_v35, %v909_v37  ;;  %v1153_v39 = vpop.f32.mrb[29].mxu1 }
 0x2f9   :  { %v912_v46 = vpop.f32.mrb[30].mxu1 }
 0x2fa   :  { %915 = vst [vmem:[%s1458_s5] sm:$0xff] %v910_v38  ;;  %v1154_v40 = vpop.f32.mrb[31].mxu1 }

</bundles_post_ra>
